<compile_context>
chip_gen: v5e
topology: v5e:2x2
jax: 0.10.0
libtpu: 0.0.40
codegen_flags: <defaults>
</compile_context>

<pallas_src>
import functools

import jax
import jax.numpy as jnp
from jax.experimental import pallas as pl
from jax.experimental.pallas import tpu as pltpu


# --------------------------------------------------------------------------- #
# Kernel
# --------------------------------------------------------------------------- #
def basic_block_kernel(x_ref, w1_ref, w2_ref, sup_ref, sdn_ref, o_ref, *, wp):
    """x_ref: (NH, W*Cin) f32   w{1,2}_ref: (W*Cin, 3*W*Cout) block-circulant
    sup_ref/sdn_ref: (NH, NH) zero-padded +/-1 row-shift matrices
    o_ref: (NH, W*Cout) f32 (lane-dense)."""
    x = x_ref[...]                       # (NH, 128)  full-lane load
    s_up = sup_ref[...]                  # (NH, NH)
    s_dn = sdn_ref[...]

    def conv(v, w_ref):
        # One lane-dense MXU matmul covering all 3 kh taps (circular W folded in).
        y = jnp.dot(v, w_ref[...], preferred_element_type=jnp.float32)   # (NH, 3*wp)
        y_top, y_mid, y_bot = y[:, :wp], y[:, wp:2 * wp], y[:, 2 * wp:]  # 128-aligned
        # Zero-padded H shift (per image) realized as tiny matmuls on the MXU.
        return (jnp.dot(s_up, y_top, preferred_element_type=jnp.float32)
                + y_mid
                + jnp.dot(s_dn, y_bot, preferred_element_type=jnp.float32))

    h1 = jnp.maximum(conv(x, w1_ref), 0.0)       # conv1 + relu
    out = conv(h1, w2_ref) + x                   # conv2 + identity add
    o_ref[...] = jnp.maximum(out, 0.0)           # relu, unmasked full-lane store


# --------------------------------------------------------------------------- #
# Wrapper-side packing (done once, outside the kernel)
# --------------------------------------------------------------------------- #
def _pack_circulant_weights(w_hwio, W):
    """(3,3,Cin,Cout) HWIO -> (W*Cin, 3*W*Cout).

    Column block kh holds the block-circulant matrix M_kh with
    M_kh[w_in*Cin+ci, w_out*Cout+co] = sum_kw w[kh,kw,ci,co] * [w_in == (w_out+kw-1) mod W],
    i.e. the circular-W padding is absorbed into the weight layout.
    """
    kh, kw, cin, cout = w_hwio.shape
    assert kh == 3 and kw == 3
    a = jnp.arange(W)
    taps = [(a[:, None] == ((a + k - 1) % W)[None, :]).astype(jnp.float32)
            for k in range(3)]                                   # each (W_in, W_out)
    P = jnp.stack(taps)                                          # (3, W, W)
    circ = jnp.einsum("kab,hkio->haibo", P, w_hwio.astype(jnp.float32))
    circ = circ.reshape(3, W * cin, W * cout)                    # per-kh circulants
    return jnp.transpose(circ, (1, 0, 2)).reshape(W * cin, 3 * W * cout)


def _h_shift_matrices(N, H):
    """Zero-padded +/-1 row shifts on the flattened (N*H) row axis.

    s_up[i, j] = 1 iff j == i-1 and row i is not the first row of its image.
    s_dn[i, j] = 1 iff j == i+1 and row i is not the last  row of its image.
    """
    r = jnp.arange(N * H)
    h = r % H
    s_up = ((r[:, None] - 1 == r[None, :]) & (h[:, None] != 0)).astype(jnp.float32)
    s_dn = ((r[:, None] + 1 == r[None, :]) & (h[:, None] != H - 1)).astype(jnp.float32)
    return s_up, s_dn


def basic_block_pallas(x_nchw, w1_hwio, w2_hwio):
    """x_nchw: (N, C, H, W). Weights in HWIO (3, 3, Cin, Cout). Returns NCHW f32.

    NOTE: in a full network the packed (N*H, W*C) activation layout and the
    packed weights should be kept across consecutive blocks; the NCHW <-> packed
    relayout here is only done at the module boundary to match the PyTorch spec.
    """
    N, C, H, W = x_nchw.shape
    P = w1_hwio.shape[-1]
    assert w1_hwio.shape == (3, 3, C, P) and w2_hwio.shape == (3, 3, P, P)
    assert C == P, "identity add requires inplanes == planes when downsample=None"
    NH, WC, WP = N * H, W * C, W * P

    x2d = jnp.transpose(x_nchw, (0, 2, 3, 1)).reshape(NH, WC).astype(jnp.float32)
    wc1 = _pack_circulant_weights(w1_hwio, W)        # (WC, 3*WP)
    wc2 = _pack_circulant_weights(w2_hwio, W)        # (WP, 3*WP)
    s_up, s_dn = _h_shift_matrices(N, H)             # (NH, NH) each

    out2d = pl.pallas_call(
        functools.partial(basic_block_kernel, wp=WP),
        out_shape=jax.ShapeDtypeStruct((NH, WP), jnp.float32),
        grid=(1,),
        in_specs=[
            pl.BlockSpec((NH, WC), lambda i: (0, 0)),
            pl.BlockSpec((WC, 3 * WP), lambda i: (0, 0)),
            pl.BlockSpec((WP, 3 * WP), lambda i: (0, 0)),
            pl.BlockSpec((NH, NH), lambda i: (0, 0)),
            pl.BlockSpec((NH, NH), lambda i: (0, 0)),
        ],
        out_specs=pl.BlockSpec((NH, WP), lambda i: (0, 0)),
        compiler_params=pltpu.CompilerParams(
            dimension_semantics=("arbitrary",)),
    )(x2d, wc1, wc2, s_up, s_dn)

    return jnp.transpose(out2d.reshape(N, H, W, P), (0, 3, 1, 2))   # -> NCHW


# --------------------------------------------------------------------------- #
# Pure-JAX reference (mirrors the PyTorch forward) and a tiny smoke test
# --------------------------------------------------------------------------- #
def basic_block_reference(x_nchw, w1_hwio, w2_hwio):
    def conv(x, w):
        xp = jnp.concatenate([x[..., -1:], x, x[..., :1]], axis=-1)   # circular W
        return jax.lax.conv_general_dilated(
            xp, w, window_strides=(1, 1), padding=((1, 1), (0, 0)),   # zero H
            dimension_numbers=("NCHW", "HWIO", "NCHW"))
    out = jax.nn.relu(conv(x_nchw, w1_hwio))
    out = conv(out, w2_hwio)
    return jax.nn.relu(out + x_nchw)


if __name__ == "__main__":
    # Small shapes consistent with the module: N=2, inplanes=planes=8, H=W=16
    # (W * C = 128 packs the full TPU lane axis).
    N, C, H, W = 2, 8, 16, 16
    planes = C  # identity add requires inplanes == planes when downsample=None

    key = jax.random.PRNGKey(0)
    kx, k1, k2 = jax.random.split(key, 3)
    x = jax.random.normal(kx, (N, C, H, W), dtype=jnp.float32)
    fan_in = C * 9
    w1 = jax.random.normal(k1, (3, 3, C, planes), dtype=jnp.float32) * (2.0 / fan_in) ** 0.5
    w2 = jax.random.normal(k2, (3, 3, planes, planes), dtype=jnp.float32) * (2.0 / (planes * 9)) ** 0.5

    out = jax.block_until_ready(basic_block_pallas(x, w1, w2))
    ref = jax.block_until_ready(basic_block_reference(x, w1, w2))

    assert out.shape == (N, planes, H, W), out.shape
    assert jnp.allclose(out, ref, atol=2e-4, rtol=2e-4), "mismatch vs reference"
    print("KERNEL_OK")
</pallas_src>

<mosaic_0001>
module attributes {stable_mosaic.version = 11 : i64} {
  func.func @basic_block_kernel(%arg0: i32, %arg1: memref<32x128xf32, #tpu.memory_space<vmem>>, %arg2: memref<128x384xf32, #tpu.memory_space<vmem>>, %arg3: memref<128x384xf32, #tpu.memory_space<vmem>>, %arg4: memref<32x32xf32, #tpu.memory_space<vmem>>, %arg5: memref<32x32xf32, #tpu.memory_space<vmem>>, %arg6: memref<32x128xf32, #tpu.memory_space<vmem>>) attributes {dimension_semantics = [#tpu.dimension_semantics<arbitrary>], iteration_bounds = array<i64: 1>, scalar_prefetch = 0 : i64, scratch_operands = 0 : i64, tpu.core_type = #tpu.core_type<tc>, window_params = [{pipeline_mode = #tpu.pipeline_mode<synchronous>, transform_indices = @transform_0, window_bounds = array<i64: 32, 128>}, {pipeline_mode = #tpu.pipeline_mode<synchronous>, transform_indices = @transform_1, window_bounds = array<i64: 128, 384>}, {pipeline_mode = #tpu.pipeline_mode<synchronous>, transform_indices = @transform_2, window_bounds = array<i64: 128, 384>}, {pipeline_mode = #tpu.pipeline_mode<synchronous>, transform_indices = @transform_3, window_bounds = array<i64: 32, 32>}, {pipeline_mode = #tpu.pipeline_mode<synchronous>, transform_indices = @transform_4, window_bounds = array<i64: 32, 32>}, {pipeline_mode = #tpu.pipeline_mode<synchronous>, transform_indices = @transform_5, window_bounds = array<i64: 32, 128>}]} {
    %c0 = arith.constant 0 : index
    %c0_0 = arith.constant 0 : index
    %0 = vector.load %arg1[%c0, %c0_0] : memref<32x128xf32, #tpu.memory_space<vmem>>, vector<32x128xf32>
    %c0_1 = arith.constant 0 : index
    %c0_2 = arith.constant 0 : index
    %1 = vector.load %arg4[%c0_1, %c0_2] : memref<32x32xf32, #tpu.memory_space<vmem>>, vector<32x32xf32>
    %c0_3 = arith.constant 0 : index
    %c0_4 = arith.constant 0 : index
    %2 = vector.load %arg5[%c0_3, %c0_4] : memref<32x32xf32, #tpu.memory_space<vmem>>, vector<32x32xf32>
    %c0_5 = arith.constant 0 : index
    %c0_6 = arith.constant 0 : index
    %3 = vector.load %arg2[%c0_5, %c0_6] : memref<128x384xf32, #tpu.memory_space<vmem>>, vector<128x384xf32>
    %cst = arith.constant dense<0.000000e+00> : vector<32x384xf32>
    %4 = tpu.matmul %0, %3, %cst {dimension_numbers = #tpu.dot_dimension_numbers<[1], [0], [0], [1], [0, 0, 1, 1], [], []>} : vector<32x128xf32>, vector<128x384xf32>, vector<32x384xf32> -> vector<32x384xf32>
    %5 = vector.extract_strided_slice %4 {offsets = [0, 0], sizes = [32, 128], strides = [1, 1]} : vector<32x384xf32> to vector<32x128xf32>
    %6 = vector.extract_strided_slice %4 {offsets = [0, 128], sizes = [32, 128], strides = [1, 1]} : vector<32x384xf32> to vector<32x128xf32>
    %7 = vector.extract_strided_slice %4 {offsets = [0, 256], sizes = [32, 128], strides = [1, 1]} : vector<32x384xf32> to vector<32x128xf32>
    %cst_7 = arith.constant dense<0.000000e+00> : vector<32x128xf32>
    %8 = tpu.matmul %1, %5, %cst_7 {dimension_numbers = #tpu.dot_dimension_numbers<[1], [0], [0], [1], [0, 0, 1, 1], [], []>} : vector<32x32xf32>, vector<32x128xf32>, vector<32x128xf32> -> vector<32x128xf32>
    %9 = arith.addf %8, %6 : vector<32x128xf32>
    %cst_8 = arith.constant dense<0.000000e+00> : vector<32x128xf32>
    %10 = tpu.matmul %2, %7, %cst_8 {dimension_numbers = #tpu.dot_dimension_numbers<[1], [0], [0], [1], [0, 0, 1, 1], [], []>} : vector<32x32xf32>, vector<32x128xf32>, vector<32x128xf32> -> vector<32x128xf32>
    %11 = arith.addf %9, %10 : vector<32x128xf32>
    %cst_9 = arith.constant 0.000000e+00 : f32
    %12 = vector.broadcast %cst_9 : f32 to vector<32x128xf32>
    %13 = arith.maximumf %11, %12 : vector<32x128xf32>
    %c0_10 = arith.constant 0 : index
    %c0_11 = arith.constant 0 : index
    %14 = vector.load %arg3[%c0_10, %c0_11] : memref<128x384xf32, #tpu.memory_space<vmem>>, vector<128x384xf32>
    %cst_12 = arith.constant dense<0.000000e+00> : vector<32x384xf32>
    %15 = tpu.matmul %13, %14, %cst_12 {dimension_numbers = #tpu.dot_dimension_numbers<[1], [0], [0], [1], [0, 0, 1, 1], [], []>} : vector<32x128xf32>, vector<128x384xf32>, vector<32x384xf32> -> vector<32x384xf32>
    %16 = vector.extract_strided_slice %15 {offsets = [0, 0], sizes = [32, 128], strides = [1, 1]} : vector<32x384xf32> to vector<32x128xf32>
    %17 = vector.extract_strided_slice %15 {offsets = [0, 128], sizes = [32, 128], strides = [1, 1]} : vector<32x384xf32> to vector<32x128xf32>
    %18 = vector.extract_strided_slice %15 {offsets = [0, 256], sizes = [32, 128], strides = [1, 1]} : vector<32x384xf32> to vector<32x128xf32>
    %cst_13 = arith.constant dense<0.000000e+00> : vector<32x128xf32>
    %19 = tpu.matmul %1, %16, %cst_13 {dimension_numbers = #tpu.dot_dimension_numbers<[1], [0], [0], [1], [0, 0, 1, 1], [], []>} : vector<32x32xf32>, vector<32x128xf32>, vector<32x128xf32> -> vector<32x128xf32>
    %20 = arith.addf %19, %17 : vector<32x128xf32>
    %cst_14 = arith.constant dense<0.000000e+00> : vector<32x128xf32>
    %21 = tpu.matmul %2, %18, %cst_14 {dimension_numbers = #tpu.dot_dimension_numbers<[1], [0], [0], [1], [0, 0, 1, 1], [], []>} : vector<32x32xf32>, vector<32x128xf32>, vector<32x128xf32> -> vector<32x128xf32>
    %22 = arith.addf %20, %21 : vector<32x128xf32>
    %23 = arith.addf %22, %0 : vector<32x128xf32>
    %cst_15 = arith.constant 0.000000e+00 : f32
    %24 = vector.broadcast %cst_15 : f32 to vector<32x128xf32>
    %25 = arith.maximumf %23, %24 : vector<32x128xf32>
    %c0_16 = arith.constant 0 : index
    %c0_17 = arith.constant 0 : index
    %26 = vector.load %arg6[%c0_16, %c0_17] : memref<32x128xf32, #tpu.memory_space<vmem>>, vector<32x128xf32>
    tpu.vector_store %arg6[%c0_16, %c0_17], %25 {strides = array<i32>} : memref<32x128xf32, #tpu.memory_space<vmem>>, vector<32x128xf32>,
    return
  }
  func.func @transform_0(%arg0: i32) -> (i32, i32) {
    %c0_i32 = arith.constant 0 : i32
    %c0_i32_0 = arith.constant 0 : i32
    %c0_i32_1 = arith.constant 0 : i32
    return %c0_i32, %c0_i32_0 : i32, i32
  }
  func.func @transform_1(%arg0: i32) -> (i32, i32) {
    %c0_i32 = arith.constant 0 : i32
    %c0_i32_0 = arith.constant 0 : i32
    %c0_i32_1 = arith.constant 0 : i32
    return %c0_i32, %c0_i32_0 : i32, i32
  }
  func.func @transform_2(%arg0: i32) -> (i32, i32) {
    %c0_i32 = arith.constant 0 : i32
    %c0_i32_0 = arith.constant 0 : i32
    %c0_i32_1 = arith.constant 0 : i32
    return %c0_i32, %c0_i32_0 : i32, i32
  }
  func.func @transform_3(%arg0: i32) -> (i32, i32) {
    %c0_i32 = arith.constant 0 : i32
    %c0_i32_0 = arith.constant 0 : i32
    %c0_i32_1 = arith.constant 0 : i32
    return %c0_i32, %c0_i32_0 : i32, i32
  }
  func.func @transform_4(%arg0: i32) -> (i32, i32) {
    %c0_i32 = arith.constant 0 : i32
    %c0_i32_0 = arith.constant 0 : i32
    %c0_i32_1 = arith.constant 0 : i32
    return %c0_i32, %c0_i32_0 : i32, i32
  }
  func.func @transform_5(%arg0: i32) -> (i32, i32) {
    %c0_i32 = arith.constant 0 : i32
    %c0_i32_0 = arith.constant 0 : i32
    %c0_i32_1 = arith.constant 0 : i32
    return %c0_i32, %c0_i32_0 : i32, i32
  }
}

</mosaic_0001>

<bundles_post_ra>
// kernel: tpu_custom_call.1
= control target key start
LH: loop header
LB: loop body
LE: loop exit
PB: predicated region body
PF: predicated region fallthrough
CT: control target
= control target key end

     0   :  { %10 = vsyncpa [#allocation3], 0  ;;  %s895_s0 = inlined_call_operand.hbm [shape: f32[32,128], index: 0, kind: input, shape index: {}]   ;;  %s896_s1 = inlined_call_operand.hbm [shape: f32[128,384], index: 1, kind: input, shape index: {}]   ;;  %s897_s2 = inlined_call_operand.hbm [shape: f32[128,384], index: 2, kind: input, shape index: {}]   ;;  %s898_s3 = inlined_call_operand.hbm [shape: f32[32,32], index: 3, kind: input, shape index: {}]   ;;  %s899_s4 = inlined_call_operand.hbm [shape: f32[32,32], index: 4, kind: input, shape index: {}]   ;;  %s900_s5 = inlined_call_operand.hbm [shape: f32[32,128], index: 5, kind: output, shape index: {}]  }
   0x1   :  { %11 = vsyncpa [#allocation6], 0 }
   0x2   :  { %12 = vsyncpa [#allocation9], 0  ;;  %s31_s20 = sshll.u32 %s896_s1, 4  ;;  %s32_s20 = int_to_ptr.hbm [resolvable:$true] %s31_s20 }
   0x3   :  { %13 = vsyncpa [#allocation4], 0  ;;  %s753_s21 = smov [#allocation5]   ;;  %s754_s23 = smov 384  }
   0x4   :  { %s33_s22 = sshll.u32 %s753_s21, 4  ;;  %s755_s24 = smov 24   ;;  %s34_s22 = int_to_ptr.vmem [resolvable:$true] %s33_s22 }
   0x5   :  { %39 = dma.hbm_to_vmem [thread:$0]  %s32_s20, 6144, %s34_s22, [#allocation6], %s754_s23, %s754_s23, %s755_s24  }
   0x6   :  { %s57_s27 = sshll.u32 %s898_s3, 4  ;;  %s756_s28 = smov [#allocation8]   ;;  %s58_s27 = int_to_ptr.hbm [resolvable:$true] %s57_s27 }
   0x7   :  { %s59_s29 = sshll.u32 %s756_s28, 4  ;;  %s18_s7 = sshll.u32 %s895_s0, 4  ;;  %s60_s29 = int_to_ptr.vmem [resolvable:$true] %s59_s29  ;;  %s19_s7 = int_to_ptr.hbm [resolvable:$true] %s18_s7 }
   0x8   :  { %s757_s1 = smov 128   ;;  %s758_s8 = smov 8  }
   0x9   :  { %65 = dma.hbm_to_vmem [thread:$0]  %s58_s27, 512, %s60_s29, [#allocation9], %s757_s1, %s757_s1, %s758_s8  }
   0xa   :  { %s44_s11 = sshll.u32 %s897_s2, 4  ;;  %s759_s3 = smov [#allocation2]   ;;  %s45_s11 = int_to_ptr.hbm [resolvable:$true] %s44_s11 }
   0xb   :  { %s20_s12 = sshll.u32 %s759_s3, 4  ;;  %s760_s0 = smov [#allocation7]   ;;  %s21_s12 = int_to_ptr.vmem [resolvable:$true] %s20_s12 }
   0xc   :  { %26 = dma.hbm_to_vmem [thread:$0]  %s19_s7, 512, %s21_s12, [#allocation3], %s757_s1, %s757_s1, %s758_s8  }
   0xd   :  { %s46_s13 = sshll.u32 %s760_s0, 4  ;;  %s70_s16 = sshll.u32 %s899_s4, 4  ;;  %s47_s13 = int_to_ptr.vmem [resolvable:$true] %s46_s13  ;;  %s71_s16 = int_to_ptr.hbm [resolvable:$true] %s70_s16 }
   0xe   :  { %52 = dma.hbm_to_vmem [thread:$0]  %s45_s11, 6144, %s47_s13, [#allocation6], %s754_s23, %s754_s23, %s755_s24  }
   0xf   :  { %s761_s17 = smov [#allocation10]  }
  0x10   :  { %s72_s18 = sshll.u32 %s761_s17, 4  ;;  %s73_s18 = int_to_ptr.vmem [resolvable:$true] %s72_s18 }
  0x11   :  { %78 = dma.hbm_to_vmem [thread:$0]  %s71_s16, 512, %s73_s18, [#allocation9], %s757_s1, %s757_s1, %s758_s8  }
  0x12   :  { %745 = dma.done.wait [#allocation3], 512  }
  0x13   :  { %746 = vsyncadd [#allocation3], 4294966784 }
  0x14   :  { %747 = dma.done.wait [#allocation6], 12288  }
  0x15   :  { %748 = vsyncadd [#allocation6], 4294955008 }
  0x16   :  { %749 = dma.done.wait [#allocation9], 1024  }
  0x17   :  { %750 = vsyncadd [#allocation9], 4294966272  ;;  %v156_v0 = vld [vmem:[#allocation5 + $0x168] sm:$0xff]  ;;  %v158_v1 = vld [vmem:[#allocation5 + $0x178] sm:$0xff]  ;;  %vm246_vm0 = vcmask 261120   ;;  %s762_s2 = smov [#allocation11]  }
  0x18   :  { %v153_v2 = vld [vmem:[#allocation5 + $0x150] sm:$0xff]  ;;  %159 = vmatpush.msra.mxu0 %v156_v0  ;;  %217 = vmatpush.msra.mxu2 %v158_v1  ;;  %v155_v3 = vld [vmem:[#allocation5 + $0x160] sm:$0xff]  ;;  %v150_v4 = vld [vmem:[#allocation5 + $0x138] sm:$0xff]  ;;  %s550_s4 = sshll.u32 %s762_s2, 4  ;;  %s552_s21 = sshll.u32 %s900_s5, 4  ;;  %s551_s4 = int_to_ptr.vmem [resolvable:$true] %s550_s4  ;;  %s553_s21 = int_to_ptr.hbm [resolvable:$true] %s552_s21 }
  0x19   :  { %v152_v5 = vld [vmem:[#allocation5 + $0x148] sm:$0xff]  ;;  %v147_v6 = vld [vmem:[#allocation5 + $0x120] sm:$0xff]  ;;  %v149_v7 = vld [vmem:[#allocation5 + $0x130] sm:$0xff] }
  0x1a   :  { %160 = vmatpush.msra.mxu0 %v153_v2  ;;  %218 = vmatpush.msra.mxu2 %v155_v3  ;;  %v144_v8 = vld [vmem:[#allocation5 + $0x108] sm:$0xff]  ;;  %v146_v9 = vld [vmem:[#allocation5 + $0x118] sm:$0xff]  ;;  %v141_v10 = vld [vmem:[#allocation5 + $0xf0] sm:$0xff] }
  0x1b   :  { %v143_v11 = vld [vmem:[#allocation5 + $0x100] sm:$0xff]  ;;  %v138_v12 = vld [vmem:[#allocation5 + $0xd8] sm:$0xff]  ;;  %v140_v13 = vld [vmem:[#allocation5 + $0xe8] sm:$0xff] }
  0x1c   :  { %161 = vmatpush.msra.mxu0 %v150_v4  ;;  %219 = vmatpush.msra.mxu2 %v152_v5  ;;  %v135_v14 = vld [vmem:[#allocation5 + $0xc0] sm:$0xff]  ;;  %v137_v15 = vld [vmem:[#allocation5 + $0xd0] sm:$0xff]  ;;  %v132_v16 = vld [vmem:[#allocation5 + $0xa8] sm:$0xff] }
  0x1d   :  { %v134_v17 = vld [vmem:[#allocation5 + $0xb8] sm:$0xff]  ;;  %v129_v18 = vld [vmem:[#allocation5 + $0x90] sm:$0xff]  ;;  %v131_v19 = vld [vmem:[#allocation5 + $0xa0] sm:$0xff] }
  0x1e   :  { %162 = vmatpush.msra.mxu0 %v147_v6  ;;  %220 = vmatpush.msra.mxu2 %v149_v7  ;;  %v126_v20 = vld [vmem:[#allocation5 + $0x78] sm:$0xff]  ;;  %v128_v21 = vld [vmem:[#allocation5 + $0x88] sm:$0xff]  ;;  %v123_v22 = vld [vmem:[#allocation5 + $0x60] sm:$0xff] }
  0x1f   :  { %v125_v23 = vld [vmem:[#allocation5 + $0x70] sm:$0xff]  ;;  %v120_v24 = vld [vmem:[#allocation5 + $0x48] sm:$0xff]  ;;  %v122_v25 = vld [vmem:[#allocation5 + $0x58] sm:$0xff] }
  0x20   :  { %163 = vmatpush.msra.mxu0 %v144_v8  ;;  %221 = vmatpush.msra.mxu2 %v146_v9  ;;  %v117_v26 = vld [vmem:[#allocation5 + $0x30] sm:$0xff]  ;;  %v119_v27 = vld [vmem:[#allocation5 + $0x40] sm:$0xff]  ;;  %v114_v28 = vld [vmem:[#allocation5 + $0x18] sm:$0xff] }
  0x21   :  { %v116_v29 = vld [vmem:[#allocation5 + $0x28] sm:$0xff]  ;;  %v111_v30 = vld [vmem:[#allocation5] sm:$0xff]  ;;  %v113_v31 = vld [vmem:[#allocation5 + $0x10] sm:$0xff] }
  0x22   :  { %164 = vmatpush.msra.mxu0 %v141_v10  ;;  %222 = vmatpush.msra.mxu2 %v143_v11  ;;  %v817_v32 = vld [vmem:[#allocation2] sm:$0xff]  ;;  %v821_v33 = vld [vmem:[#allocation2 + $0x8] sm:$0xff]  ;;  %v825_v34 = vld [vmem:[#allocation2 + $0x10] sm:$0xff] }
  0x23   :  { %v829_v35 = vld [vmem:[#allocation2 + $0x18] sm:$0xff]  ;;  %v157_v36 = vld [vmem:[#allocation5 + $0x170] sm:$0xff]  ;;  %v151_v38 = vld [vmem:[#allocation5 + $0x140] sm:$0xff] }
  0x24   :  { %165 = vmatpush.msra.mxu0 %v138_v12  ;;  %223 = vmatpush.msra.mxu2 %v140_v13  ;;  %v154_v37 = vld [vmem:[#allocation5 + $0x158] sm:$0xff]  ;;  %v148_v39 = vld [vmem:[#allocation5 + $0x128] sm:$0xff]  ;;  %v145_v40 = vld [vmem:[#allocation5 + $0x110] sm:$0xff] }
  0x25   :  { %188 = vmatpush.msra.mxu1 %v157_v36  ;;  %v142_v41 = vld [vmem:[#allocation5 + $0xf8] sm:$0xff]  ;;  %v139_v42 = vld [vmem:[#allocation5 + $0xe0] sm:$0xff]  ;;  %v136_v43 = vld [vmem:[#allocation5 + $0xc8] sm:$0xff] }
  0x26   :  { %166 = vmatpush.msra.mxu0 %v135_v14  ;;  %224 = vmatpush.msra.mxu2 %v137_v15  ;;  %v133_v44 = vld [vmem:[#allocation5 + $0xb0] sm:$0xff]  ;;  %v130_v45 = vld [vmem:[#allocation5 + $0x98] sm:$0xff]  ;;  %v127_v46 = vld [vmem:[#allocation5 + $0x80] sm:$0xff] }
  0x27   :  { %189 = vmatpush.msra.mxu1 %v154_v37  ;;  %v124_v47 = vld [vmem:[#allocation5 + $0x68] sm:$0xff]  ;;  %v121_v48 = vld [vmem:[#allocation5 + $0x50] sm:$0xff]  ;;  %v118_v50 = vld [vmem:[#allocation5 + $0x38] sm:$0xff] }
  0x28   :  { %167 = vmatpush.msra.mxu0 %v132_v16  ;;  %225 = vmatpush.msra.mxu2 %v134_v17  ;;  %v115_v51 = vld [vmem:[#allocation5 + $0x20] sm:$0xff]  ;;  %v112_v52 = vld [vmem:[#allocation5 + $0x8] sm:$0xff]  ;;  %v845_v62 = vld [vmem:[#allocation8 + $0x10] sm:$0xff] }
  0x29   :  { %190 = vmatpush.msra.mxu1 %v151_v38  ;;  %v836_v59 = vld [vmem:[#allocation8] sm:$0xff]  ;;  %v841_v61 = vld [vmem:[#allocation8 + $0x8] sm:$0xff]  ;;  %v849_v63 = vld [vmem:[#allocation8 + $0x18] sm:$0xff] }
  0x2a   :  { %168 = vmatpush.msra.mxu0 %v129_v18  ;;  %226 = vmatpush.msra.mxu2 %v131_v19  ;;  %v853_v0 = vld [vmem:[#allocation10] sm:$0xff]  ;;  %v857_v1 = vld [vmem:[#allocation10 + $0x8] sm:$0xff]  ;;  %v861_v2 = vld [vmem:[#allocation10 + $0x10] sm:$0xff] }
  0x2b   :  { %191 = vmatpush.msra.mxu1 %v148_v39  ;;  %v865_v3 = vld [vmem:[#allocation10 + $0x18] sm:$0xff]  ;;  %v382_v4 = vld [vmem:[#allocation7 + $0x168] sm:$0xff]  ;;  %v383_v5 = vld [vmem:[#allocation7 + $0x170] sm:$0xff] }
  0x2c   :  { %169 = vmatpush.msra.mxu0 %v126_v20  ;;  %227 = vmatpush.msra.mxu2 %v128_v21  ;;  %v384_v6 = vld [vmem:[#allocation7 + $0x178] sm:$0xff]  ;;  %v379_v7 = vld [vmem:[#allocation7 + $0x150] sm:$0xff]  ;;  %v381_v9 = vld [vmem:[#allocation7 + $0x160] sm:$0xff] }
  0x2d   :  { %192 = vmatpush.msra.mxu1 %v145_v40  ;;  %v380_v8 = vld [vmem:[#allocation7 + $0x158] sm:$0xff]  ;;  %v377_v11 = vld [vmem:[#allocation7 + $0x140] sm:$0xff]  ;;  %v378_v12 = vld [vmem:[#allocation7 + $0x148] sm:$0xff] }
  0x2e   :  { %170 = vmatpush.msra.mxu0 %v123_v22  ;;  %228 = vmatpush.msra.mxu2 %v125_v23  ;;  %v376_v10 = vld [vmem:[#allocation7 + $0x138] sm:$0xff]  ;;  %v373_v13 = vld [vmem:[#allocation7 + $0x120] sm:$0xff]  ;;  %v374_v14 = vld [vmem:[#allocation7 + $0x128] sm:$0xff] }
  0x2f   :  { %193 = vmatpush.msra.mxu1 %v142_v41  ;;  %v375_v15 = vld [vmem:[#allocation7 + $0x130] sm:$0xff]  ;;  %v370_v16 = vld [vmem:[#allocation7 + $0x108] sm:$0xff]  ;;  %v372_v18 = vld [vmem:[#allocation7 + $0x118] sm:$0xff] }
  0x30   :  { %171 = vmatpush.msra.mxu0 %v120_v24  ;;  %229 = vmatpush.msra.mxu2 %v122_v25  ;;  %v371_v17 = vld [vmem:[#allocation7 + $0x110] sm:$0xff]  ;;  %v368_v20 = vld [vmem:[#allocation7 + $0xf8] sm:$0xff]  ;;  %v369_v21 = vld [vmem:[#allocation7 + $0x100] sm:$0xff] }
  0x31   :  { %194 = vmatpush.msra.mxu1 %v139_v42  ;;  %v367_v19 = vld [vmem:[#allocation7 + $0xf0] sm:$0xff]  ;;  %v364_v22 = vld [vmem:[#allocation7 + $0xd8] sm:$0xff]  ;;  %v365_v23 = vld [vmem:[#allocation7 + $0xe0] sm:$0xff] }
  0x32   :  { %172 = vmatpush.msra.mxu0 %v117_v26  ;;  %230 = vmatpush.msra.mxu2 %v119_v27  ;;  %v366_v24 = vld [vmem:[#allocation7 + $0xe8] sm:$0xff]  ;;  %v361_v25 = vld [vmem:[#allocation7 + $0xc0] sm:$0xff]  ;;  %v363_v27 = vld [vmem:[#allocation7 + $0xd0] sm:$0xff] }
  0x33   :  { %195 = vmatpush.msra.mxu1 %v136_v43  ;;  %v362_v26 = vld [vmem:[#allocation7 + $0xc8] sm:$0xff]  ;;  %v356_v36 = vld [vmem:[#allocation7 + $0x98] sm:$0xff]  ;;  %v357_v37 = vld [vmem:[#allocation7 + $0xa0] sm:$0xff] }
  0x34   :  { %173 = vmatpush.msra.mxu0 %v114_v28  ;;  %231 = vmatpush.msra.mxu2 %v116_v29  ;;  %v358_v28 = vld [vmem:[#allocation7 + $0xa8] sm:$0xff]  ;;  %v359_v29 = vld [vmem:[#allocation7 + $0xb0] sm:$0xff]  ;;  %v352_v38 = vld [vmem:[#allocation7 + $0x78] sm:$0xff] }
  0x35   :  { %196 = vmatpush.msra.mxu1 %v133_v44  ;;  %v353_v39 = vld [vmem:[#allocation7 + $0x80] sm:$0xff]  ;;  %v354_v40 = vld [vmem:[#allocation7 + $0x88] sm:$0xff]  ;;  %v351_v43 = vld [vmem:[#allocation7 + $0x70] sm:$0xff] }
  0x36   :  { %174 = vmatpush.msra.mxu0 %v111_v30  ;;  %232 = vmatpush.msra.mxu2 %v113_v31  ;;  %v360_v30 = vld [vmem:[#allocation7 + $0xb8] sm:$0xff]  ;;  %v355_v31 = vld [vmem:[#allocation7 + $0x90] sm:$0xff]  ;;  %v349_v41 = vld [vmem:[#allocation7 + $0x60] sm:$0xff] }
  0x37   :  { %175 = vmatmul.f32.vlgmr.msra.gmra.mxu0 %v817_v32  ;;  %233 = vmatmul.f32.vlgmr.msra.gmra.mxu2 %v817_v32  ;;  %v350_v42 = vld [vmem:[#allocation7 + $0x68] sm:$0xff] }
  0x38   :  { %197 = vmatpush.msra.mxu1 %v130_v45  ;;  %385 = vmatpush.msrb.mxu0 %v382_v4  ;;  %v346_v44 = vld [vmem:[#allocation7 + $0x48] sm:$0xff]  ;;  %v347_v45 = vld [vmem:[#allocation7 + $0x50] sm:$0xff] }
  0x39   :  { %443 = vmatpush.msrb.mxu2 %v384_v6 }
  0x3a   :  { %198 = vmatpush.msra.mxu1 %v127_v46  ;;  %386 = vmatpush.msrb.mxu0 %v379_v7  ;;  %v348_v46 = vld [vmem:[#allocation7 + $0x58] sm:$0xff] }
  0x3b   :  { %444 = vmatpush.msrb.mxu2 %v381_v9 }
  0x3c   :  { %199 = vmatpush.msra.mxu1 %v124_v47  ;;  %387 = vmatpush.msrb.mxu0 %v376_v10 }
  0x3d   :  { %445 = vmatpush.msrb.mxu2 %v378_v12 }
  0x3e   :  { %200 = vmatpush.msra.mxu1 %v121_v48  ;;  %388 = vmatpush.msrb.mxu0 %v373_v13  ;;  %v343_v48 = vld [vmem:[#allocation7 + $0x30] sm:$0xff] }
  0x3f   :  { %178 = vmatmul.f32.gmra.mxu0 %v821_v33  ;;  %236 = vmatmul.f32.gmra.mxu2 %v821_v33 }
  0x40   :  { %201 = vmatpush.msra.mxu1 %v118_v50  ;;  %446 = vmatpush.msrb.mxu2 %v375_v15  ;;  %v345_v50 = vld [vmem:[#allocation7 + $0x40] sm:$0xff] }
  0x41   :  { %389 = vmatpush.msrb.mxu0 %v370_v16 }
  0x42   :  { %202 = vmatpush.msra.mxu1 %v115_v51  ;;  %447 = vmatpush.msrb.mxu2 %v372_v18  ;;  %v340_v51 = vld [vmem:[#allocation7 + $0x18] sm:$0xff] }
  0x43   :  { %390 = vmatpush.msrb.mxu0 %v367_v19 }
  0x44   :  { %203 = vmatpush.msra.mxu1 %v112_v52  ;;  %448 = vmatpush.msrb.mxu2 %v369_v21  ;;  %v341_v52 = vld [vmem:[#allocation7 + $0x20] sm:$0xff] }
  0x45   :  { %204 = vmatmul.f32.vlgmr.msra.gmra.mxu1 %v817_v32  ;;  %391 = vmatpush.msrb.mxu0 %v364_v22 }
  0x46   :  { %414 = vmatpush.msrb.mxu1 %v383_v5  ;;  %449 = vmatpush.msrb.mxu2 %v366_v24 }
  0x47   :  { %181 = vmatmul.f32.gmra.mxu0 %v825_v34  ;;  %239 = vmatmul.f32.gmra.mxu2 %v825_v34 }
  0x48   :  { %415 = vmatpush.msrb.mxu1 %v380_v8  ;;  %392 = vmatpush.msrb.mxu0 %v361_v25 }
  0x49   :  { %450 = vmatpush.msrb.mxu2 %v363_v27 }
  0x4a   :  { %416 = vmatpush.msrb.mxu1 %v377_v11  ;;  %393 = vmatpush.msrb.mxu0 %v358_v28 }
  0x4b   :  { %451 = vmatpush.msrb.mxu2 %v360_v30 }
  0x4c   :  { %417 = vmatpush.msrb.mxu1 %v374_v14  ;;  %394 = vmatpush.msrb.mxu0 %v355_v31 }
  0x4d   :  { %207 = vmatmul.f32.gmra.mxu1 %v821_v33  ;;  %452 = vmatpush.msrb.mxu2 %v357_v37 }
  0x4e   :  { %418 = vmatpush.msrb.mxu1 %v371_v17  ;;  %395 = vmatpush.msrb.mxu0 %v352_v38 }
  0x4f   :  { %184 = vmatmul.f32.gmra.mxu0 %v829_v35  ;;  %242 = vmatmul.f32.gmra.mxu2 %v829_v35 }
  0x50   :  { %419 = vmatpush.msrb.mxu1 %v368_v20  ;;  %453 = vmatpush.msrb.mxu2 %v354_v40 }
  0x51   :  { %396 = vmatpush.msrb.mxu0 %v349_v41 }
  0x52   :  { %420 = vmatpush.msrb.mxu1 %v365_v23  ;;  %454 = vmatpush.msrb.mxu2 %v351_v43 }
  0x53   :  { %397 = vmatpush.msrb.mxu0 %v346_v44 }
  0x54   :  { %421 = vmatpush.msrb.mxu1 %v362_v26  ;;  %455 = vmatpush.msrb.mxu2 %v348_v46 }
  0x55   :  { %210 = vmatmul.f32.gmra.mxu1 %v825_v34  ;;  %398 = vmatpush.msrb.mxu0 %v343_v48 }
  0x56   :  { %422 = vmatpush.msrb.mxu1 %v359_v29  ;;  %456 = vmatpush.msrb.mxu2 %v345_v50 }
  0x57   :  { %399 = vmatpush.msrb.mxu0 %v340_v51 }
  0x58   :  { %423 = vmatpush.msrb.mxu1 %v356_v36 }
  0x5a   :  { %424 = vmatpush.msrb.mxu1 %v353_v39 }
  0x5c   :  { %425 = vmatpush.msrb.mxu1 %v350_v42 }
  0x5d   :  { %213 = vmatmul.f32.gmra.mxu1 %v829_v35 }
  0x5e   :  { %426 = vmatpush.msrb.mxu1 %v347_v45 }
  0xb4   :  { %v176_v49 = vpop.f32.mrf.mxu0 }
  0xba   :  { %v234_v53 = vpop.f32.mrf.mxu2 }
  0xbc   :  { %v179_v54 = vpop.f32.mrf.mxu0 }
  0xc2   :  { %v237_v55 = vpop.f32.mrf.mxu2 }
  0xc4   :  { %v182_v56 = vpop.f32.mrf.mxu0 }
  0xca   :  { %v240_v57 = vpop.f32.mrf.mxu2 }
  0xcc   :  { %v185_v58 = vpop.f32.mrf.mxu0 }
  0xcd   :  { %271 = vmatpush.msra.mxu3 %v185_v58 }
  0xcf   :  { %272 = vmatpush.msra.mxu3 %v182_v56  ;;  %v339_v56 = vld [vmem:[#allocation7 + $0x10] sm:$0xff] }
  0xd1   :  { %273 = vmatpush.msra.mxu3 %v179_v54  ;;  %v337_v54 = vld [vmem:[#allocation7] sm:$0xff] }
  0xd2   :  { %v243_v60 = vpop.f32.mrf.mxu2  ;;  %400 = vmatpush.msrb.mxu0 %v337_v54 }
  0xd3   :  { %274 = vmatpush.msra.mxu3 %v176_v49  ;;  %v344_v49 = vld [vmem:[#allocation7 + $0x38] sm:$0xff] }
  0xd4   :  { %567 = vmatmul.msk.f32.vlgmr.msra.gmra.mxu3 %vm246_vm0, %v836_v59  ;;  %427 = vmatpush.msrb.mxu1 %v344_v49 }
  0xd5   :  { %312 = vmatpush.msrb.mxu3 %v243_v60  ;;  %v205_v60 = vpop.f32.mrf.mxu1 }
  0xd6   :  { %428 = vmatpush.msrb.mxu1 %v341_v52 }
  0xd7   :  { %313 = vmatpush.msrb.mxu3 %v240_v57 }
  0xd9   :  { %314 = vmatpush.msrb.mxu3 %v237_v55  ;;  %v338_v55 = vld [vmem:[#allocation7 + $0x8] sm:$0xff] }
  0xda   :  { %429 = vmatpush.msrb.mxu1 %v338_v55 }
  0xdb   :  { %315 = vmatpush.msrb.mxu3 %v234_v53  ;;  %v342_v53 = vld [vmem:[#allocation7 + $0x28] sm:$0xff] }
  0xdc   :  { %568 = vmatmul.msk.f32.gmra.mxu3 %vm246_vm0, %v841_v61  ;;  %457 = vmatpush.msrb.mxu2 %v342_v53 }
  0xdd   :  { %v208_v6 = vpop.f32.mrf.mxu1 }
  0xde   :  { %458 = vmatpush.msrb.mxu2 %v339_v56 }
  0xe4   :  { %569 = vmatmul.msk.f32.gmra.mxu3 %vm246_vm0, %v845_v62 }
  0xe5   :  { %v211_v13 = vpop.f32.mrf.mxu1 }
  0xec   :  { %570 = vmatmul.msk.f32.gmra.mxu3 %vm246_vm0, %v849_v63 }
  0xed   :  { %v214_v19 = vpop.f32.mrf.mxu1 }
  0xf4   :  { %571 = vmatmul.msk.f32.vlgmr.msrb.gmra.mxu3 %vm246_vm0, %v853_v0 }
  0xfc   :  { %572 = vmatmul.msk.f32.gmra.mxu3 %vm246_vm0, %v857_v1 }
 0x104   :  { %573 = vmatmul.msk.f32.gmra.mxu3 %vm246_vm0, %v861_v2 }
 0x10c   :  { %574 = vmatmul.msk.f32.gmra.mxu3 %vm246_vm0, %v865_v3 }
 0x157   :  { %v276_v47 = vpop.f32.mrf.mxu3 }
 0x158   :  { %v277_v5 = vadd.f32 %v276_v47, %v205_v60 }
 0x15f   :  { %v279_v57 = vpop.f32.mrf.mxu3 }
 0x160   :  { %v280_v10 = vadd.f32 %v279_v57, %v208_v6 }
 0x167   :  { %v282_v58 = vpop.f32.mrf.mxu3 }
 0x168   :  { %v283_v15 = vadd.f32 %v282_v58, %v211_v13 }
 0x16f   :  { %v285_v4 = vpop.f32.mrf.mxu3 }
 0x170   :  { %v286_v20 = vadd.f32 %v285_v4, %v214_v19 }
 0x177   :  { %v317_v7 = vpop.f32.mrf.mxu3 }
 0x178   :  { %v329_v8 = vadd.f32 %v317_v7, %v277_v5 }
 0x17a   :  { %v333_v9 = vmax.f32 %v329_v8, 0.0 }
 0x17c   :  { %401 = vmatmul.f32.vlgmr.msrb.gmra.mxu0 %v333_v9  ;;  %430 = vmatmul.f32.vlgmr.msrb.gmra.mxu1 %v333_v9 }
 0x17d   :  { %459 = vmatmul.f32.vlgmr.msrb.gmra.mxu2 %v333_v9 }
 0x17f   :  { %v320_v11 = vpop.f32.mrf.mxu3 }
 0x180   :  { %v330_v12 = vadd.f32 %v320_v11, %v280_v10 }
 0x182   :  { %v334_v14 = vmax.f32 %v330_v12, 0.0 }
 0x184   :  { %404 = vmatmul.f32.gmra.mxu0 %v334_v14  ;;  %433 = vmatmul.f32.gmra.mxu1 %v334_v14 }
 0x185   :  { %462 = vmatmul.f32.gmra.mxu2 %v334_v14 }
 0x187   :  { %v323_v16 = vpop.f32.mrf.mxu3 }
 0x188   :  { %v331_v17 = vadd.f32 %v323_v16, %v283_v15 }
 0x18a   :  { %v335_v18 = vmax.f32 %v331_v17, 0.0 }
 0x18c   :  { %407 = vmatmul.f32.gmra.mxu0 %v335_v18  ;;  %436 = vmatmul.f32.gmra.mxu1 %v335_v18 }
 0x18d   :  { %465 = vmatmul.f32.gmra.mxu2 %v335_v18 }
 0x18f   :  { %v326_v21 = vpop.f32.mrf.mxu3 }
 0x190   :  { %v332_v22 = vadd.f32 %v326_v21, %v286_v20 }
 0x192   :  { %v336_v23 = vmax.f32 %v332_v22, 0.0 }
 0x194   :  { %410 = vmatmul.f32.gmra.mxu0 %v336_v23  ;;  %439 = vmatmul.f32.gmra.mxu1 %v336_v23 }
 0x195   :  { %468 = vmatmul.f32.gmra.mxu2 %v336_v23 }
 0x1f9   :  { %v402_v24 = vpop.f32.mrf.mxu0 }
 0x200   :  { %v460_v25 = vpop.f32.mrf.mxu2 }
 0x201   :  { %v405_v26 = vpop.f32.mrf.mxu0 }
 0x208   :  { %v463_v27 = vpop.f32.mrf.mxu2 }
 0x209   :  { %v408_v28 = vpop.f32.mrf.mxu0 }
 0x210   :  { %v466_v29 = vpop.f32.mrf.mxu2 }
 0x211   :  { %v411_v30 = vpop.f32.mrf.mxu0 }
 0x212   :  { %484 = vmatpush.msra.mxu3 %v411_v30 }
 0x214   :  { %485 = vmatpush.msra.mxu3 %v408_v28 }
 0x216   :  { %486 = vmatpush.msra.mxu3 %v405_v26 }
 0x218   :  { %v469_v31 = vpop.f32.mrf.mxu2  ;;  %487 = vmatpush.msra.mxu3 %v402_v24 }
 0x219   :  { %513 = vmatpush.msra.mxu0 %v469_v31  ;;  %583 = vmatpush.msra.mxu1 %v469_v31 }
 0x21a   :  { %584 = vmatpush.msra.mxu2 %v469_v31  ;;  %575 = vmatmul.msk.f32.vlgmr.msra.gmra.mxu3 %vm246_vm0, %v836_v59  ;;  %v431_v59 = vpop.f32.mrf.mxu1 }
 0x21b   :  { %514 = vmatpush.msra.mxu0 %v466_v29  ;;  %585 = vmatpush.msra.mxu1 %v466_v29 }
 0x21c   :  { %586 = vmatpush.msra.mxu2 %v466_v29 }
 0x21d   :  { %515 = vmatpush.msra.mxu0 %v463_v27  ;;  %587 = vmatpush.msra.mxu1 %v463_v27 }
 0x21e   :  { %588 = vmatpush.msra.mxu2 %v463_v27 }
 0x21f   :  { %516 = vmatpush.msra.mxu0 %v460_v25  ;;  %589 = vmatpush.msra.mxu1 %v460_v25 }
 0x220   :  { %590 = vmatpush.msra.mxu2 %v460_v25  ;;  %579 = vmatmul.msk.f32.vlgmr.msra.gmra.mxu0 %vm246_vm0, %v853_v0 }
 0x221   :  { %580 = vmatmul.msk.f32.vlgmr.msra.gmra.mxu1 %vm246_vm0, %v857_v1  ;;  %582 = vmatmul.msk.f32.vlgmr.msra.gmra.mxu2 %vm246_vm0, %v865_v3 }
 0x222   :  { %576 = vmatmul.msk.f32.gmra.mxu3 %vm246_vm0, %v841_v61  ;;  %v434_v0 = vpop.f32.mrf.mxu1 }
 0x229   :  { %581 = vmatmul.msk.f32.gmra.mxu1 %vm246_vm0, %v861_v2 }
 0x22a   :  { %577 = vmatmul.msk.f32.gmra.mxu3 %vm246_vm0, %v845_v62  ;;  %v437_v36 = vpop.f32.mrf.mxu1 }
 0x232   :  { %578 = vmatmul.msk.f32.gmra.mxu3 %vm246_vm0, %v849_v63  ;;  %v440_v37 = vpop.f32.mrf.mxu1 }
 0x29d   :  { %v489_v1 = vpop.f32.mrf.mxu3  ;;  %v518_v38 = vpop.f32.mrf.mxu0 }
 0x29e   :  { %v490_v39 = vadd.f32 %v489_v1, %v431_v59  ;;  %v521_v61 = vpop.f32.mrf.mxu1 }
 0x2a0   :  { %v530_v3 = vadd.f32 %v518_v38, %v490_v39 }
 0x2a2   :  { %v534_v40 = vadd.f32 %v530_v3, %v817_v32 }
 0x2a4   :  { %v538_v41 = vmax.f32 %v534_v40, 0.0  ;;  %v527_v51 = vpop.f32.mrf.mxu2 }
 0x2a5   :  { %v492_v42 = vpop.f32.mrf.mxu3 }
 0x2a6   :  { %542 = vst [vmem:[#allocation11] sm:$0xff] %v538_v41  ;;  %v493_v2 = vadd.f32 %v492_v42, %v434_v0  ;;  %v524_v45 = vpop.f32.mrf.mxu1 }
 0x2a8   :  { %v531_v43 = vadd.f32 %v521_v61, %v493_v2 }
 0x2aa   :  { %v535_v62 = vadd.f32 %v531_v43, %v821_v33 }
 0x2ac   :  { %v539_v44 = vmax.f32 %v535_v62, 0.0 }
 0x2ad   :  { %v495_v63 = vpop.f32.mrf.mxu3 }
 0x2ae   :  { %543 = vst [vmem:[#allocation11 + $0x8] sm:$0xff] %v539_v44  ;;  %v496_v46 = vadd.f32 %v495_v63, %v437_v36 }
 0x2b0   :  { %v532_v47 = vadd.f32 %v524_v45, %v496_v46 }
 0x2b2   :  { %v536_v48 = vadd.f32 %v532_v47, %v825_v34 }
 0x2b4   :  { %v540_v49 = vmax.f32 %v536_v48, 0.0 }
 0x2b5   :  { %v498_v50 = vpop.f32.mrf.mxu3 }
 0x2b6   :  { %544 = vst [vmem:[#allocation11 + $0x10] sm:$0xff] %v540_v49  ;;  %v499_v32 = vadd.f32 %v498_v50, %v440_v37 }
 0x2b8   :  { %v533_v52 = vadd.f32 %v527_v51, %v499_v32 }
 0x2ba   :  { %v537_v33 = vadd.f32 %v533_v52, %v829_v35 }
 0x2bc   :  { %v541_v53 = vmax.f32 %v537_v33, 0.0 }
 0x2be   :  { %545 = vst [vmem:[#allocation11 + $0x18] sm:$0xff] %v541_v53 }
 0x2bf   :  { %558 = dma.vmem_to_hbm [thread:$0]  %s551_s4, 512, %s553_s21, [#allocation4], %s757_s1, %s757_s1, %s758_s8  }
 0x2c0   :  { %751 = dma.done.wait [#allocation4], 512  }
 0x2c1   :  { %752 = vsyncadd [#allocation4], 4294966784 }
 0x2c2   :  { %563 = vsyncpa [#allocation3], 1 }
 0x2c3   :  { %564 = vsyncpa [#allocation6], 1 }
 0x2c4   :  { %565 = vsyncpa [#allocation9], 1 }
 0x2c5   :  { %566 = vsyncpa [#allocation4], 1 }

</bundles_post_ra>
